<compile_context>
chip_gen: v5e
topology: v5e:2x2
jax: 0.10.0
libtpu: 0.0.40
codegen_flags: <defaults>
</compile_context>

<pallas_src>
import jax
import jax.numpy as jnp
from jax.experimental import pallas as pl
from jax.experimental.pallas import tpu as pltpu

n_embd = 64
n_hidden = 100
LANE = 128


def ffn_kernel(x_ref, w1_ref, b1_ref, w2_ref, b2_ref, out_ref):
    # x_ref  : (N, C)    N = B*T rows, C = n_embd (contraction dim, unpadded)
    # w1_ref : (C, Hp)   pre-transposed, hidden zero-padded to Hp = 128
    # b1_ref : (1, Hp)
    # w2_ref : (Hp, Cp)  pre-transposed, hidden rows + output cols zero-padded
    # b2_ref : (1, Cp)
    # out_ref: (N, Cp)   lane-dense (128-wide) unmasked store; real data in [:, :C]
    x = x_ref[...]

    h = jnp.dot(x, w1_ref[...], preferred_element_type=jnp.float32)
    h = jnp.maximum(h + b1_ref[...], 0.0)        # bias + ReLU on the VPU, f32

    out = jnp.dot(h, w2_ref[...], preferred_element_type=jnp.float32)
    out_ref[...] = out + b2_ref[...]             # full-lane vst (Cp = 128)


def make_feed_forward(w1, b1, w2, b2):
    """w1: (H, C), b1: (H,), w2: (C, H), b2: (C,) in torch nn.Linear layout
    (weight = (out_features, in_features)).  Packs weights ONCE and returns a
    jitted forward fn of x: (B, T, C) -> (B, T, C)."""
    H, C = w1.shape
    Hp = ((H + LANE - 1) // LANE) * LANE     # hidden dim -> 128 (minimal lane multiple)
    Cp = ((C + LANE - 1) // LANE) * LANE     # output lanes -> 128 (lane-dense store)

    # One-time packing, off the per-call critical path.  Zero padding is
    # mathematically inert: padded hidden cols are 0 after ReLU and the matching
    # rows of w2T are 0; padded output cols are sliced off below.
    w1T = jnp.pad(w1.T.astype(jnp.float32), ((0, 0), (0, Hp - H)))        # (C, Hp)
    b1p = jnp.pad(b1.astype(jnp.float32), (0, Hp - H)).reshape(1, Hp)     # (1, Hp)
    w2T = jnp.pad(w2.T.astype(jnp.float32), ((0, Hp - H), (0, Cp - C)))   # (Hp, Cp)
    b2p = jnp.pad(b2.astype(jnp.float32), (0, Cp - C)).reshape(1, Cp)     # (1, Cp)

    def fwd(x):
        B, T, _ = x.shape
        N = B * T
        x2d = x.reshape(N, C)

        flops = 2 * N * C * Hp + 2 * N * Hp * Cp
        bytes_accessed = 4 * (N * C + C * Hp + Hp + Hp * Cp + Cp + N * Cp)

        out2d = pl.pallas_call(
            ffn_kernel,
            out_shape=jax.ShapeDtypeStruct((N, Cp), jnp.float32),
            # Single invocation (no grid): every operand is a whole-array VMEM block.
            in_specs=[
                pl.BlockSpec(memory_space=pltpu.MemorySpace.VMEM),  # x2d
                pl.BlockSpec(memory_space=pltpu.MemorySpace.VMEM),  # w1T
                pl.BlockSpec(memory_space=pltpu.MemorySpace.VMEM),  # b1p
                pl.BlockSpec(memory_space=pltpu.MemorySpace.VMEM),  # w2T
                pl.BlockSpec(memory_space=pltpu.MemorySpace.VMEM),  # b2p
            ],
            out_specs=pl.BlockSpec(memory_space=pltpu.MemorySpace.VMEM),
            cost_estimate=pl.CostEstimate(
                flops=flops, transcendentals=0, bytes_accessed=bytes_accessed),
        )(x2d, w1T, b1p, w2T, b2p)

        return out2d[:, :C].reshape(B, T, C)

    return jax.jit(fwd)


def reference(x, w1, b1, w2, b2):
    """Pure-JAX replica of the PyTorch forward."""
    h = jnp.maximum(x @ w1.T + b1, 0.0)
    return h @ w2.T + b2


if __name__ == "__main__":
    B, T, C = 2, 8, n_embd

    key = jax.random.PRNGKey(0)
    kx, k1, kb1, k2, kb2 = jax.random.split(key, 5)

    x = jax.random.normal(kx, (B, T, C), dtype=jnp.float32)
    # torch nn.Linear layout: weight (out, in), bias (out,)
    w1 = jax.random.normal(k1, (n_hidden, n_embd), dtype=jnp.float32) * 0.1
    b1 = jax.random.normal(kb1, (n_hidden,), dtype=jnp.float32) * 0.1
    w2 = jax.random.normal(k2, (n_embd, n_hidden), dtype=jnp.float32) * 0.1
    b2 = jax.random.normal(kb2, (n_embd,), dtype=jnp.float32) * 0.1

    feed_forward = make_feed_forward(w1, b1, w2, b2)   # packs weights once
    out = jax.block_until_ready(feed_forward(x))

    ref = reference(x, w1, b1, w2, b2)
    assert out.shape == (B, T, C)
    assert jnp.allclose(out, ref, atol=1e-4, rtol=1e-4)

    print("KERNEL_OK")
</pallas_src>

<mosaic_0001>
module attributes {stable_mosaic.version = 11 : i64} {
  func.func @ffn_kernel(%arg0: memref<16x64xf32, #tpu.memory_space<vmem>>, %arg1: memref<64x128xf32, #tpu.memory_space<vmem>>, %arg2: memref<1x128xf32, #tpu.memory_space<vmem>>, %arg3: memref<128x128xf32, #tpu.memory_space<vmem>>, %arg4: memref<1x128xf32, #tpu.memory_space<vmem>>, %arg5: memref<16x128xf32, #tpu.memory_space<vmem>>) attributes {dimension_semantics = [], scalar_prefetch = 0 : i64, scratch_operands = 0 : i64, tpu.core_type = #tpu.core_type<tc>} {
    %c0 = arith.constant 0 : index
    %c0_0 = arith.constant 0 : index
    %0 = vector.load %arg0[%c0, %c0_0] : memref<16x64xf32, #tpu.memory_space<vmem>>, vector<16x64xf32>
    %c0_1 = arith.constant 0 : index
    %c0_2 = arith.constant 0 : index
    %1 = vector.load %arg1[%c0_1, %c0_2] : memref<64x128xf32, #tpu.memory_space<vmem>>, vector<64x128xf32>
    %cst = arith.constant dense<0.000000e+00> : vector<16x128xf32>
    %2 = tpu.matmul %0, %1, %cst {dimension_numbers = #tpu.dot_dimension_numbers<[1], [0], [0], [1], [0, 0, 1, 1], [], []>} : vector<16x64xf32>, vector<64x128xf32>, vector<16x128xf32> -> vector<16x128xf32>
    %c0_3 = arith.constant 0 : index
    %c0_4 = arith.constant 0 : index
    %3 = vector.load %arg2[%c0_3, %c0_4] : memref<1x128xf32, #tpu.memory_space<vmem>>, vector<1x128xf32>
    %4 = vector.broadcast %3 : vector<1x128xf32> to vector<16x128xf32>
    %5 = arith.addf %2, %4 : vector<16x128xf32>
    %cst_5 = arith.constant 0.000000e+00 : f32
    %6 = vector.broadcast %cst_5 : f32 to vector<16x128xf32>
    %7 = arith.maximumf %5, %6 : vector<16x128xf32>
    %c0_6 = arith.constant 0 : index
    %c0_7 = arith.constant 0 : index
    %8 = vector.load %arg3[%c0_6, %c0_7] : memref<128x128xf32, #tpu.memory_space<vmem>>, vector<128x128xf32>
    %cst_8 = arith.constant dense<0.000000e+00> : vector<16x128xf32>
    %9 = tpu.matmul %7, %8, %cst_8 {dimension_numbers = #tpu.dot_dimension_numbers<[1], [0], [0], [1], [0, 0, 1, 1], [], []>} : vector<16x128xf32>, vector<128x128xf32>, vector<16x128xf32> -> vector<16x128xf32>
    %c0_9 = arith.constant 0 : index
    %c0_10 = arith.constant 0 : index
    %10 = vector.load %arg4[%c0_9, %c0_10] : memref<1x128xf32, #tpu.memory_space<vmem>>, vector<1x128xf32>
    %11 = vector.broadcast %10 : vector<1x128xf32> to vector<16x128xf32>
    %12 = arith.addf %9, %11 : vector<16x128xf32>
    %c0_11 = arith.constant 0 : index
    %c0_12 = arith.constant 0 : index
    %13 = vector.load %arg5[%c0_11, %c0_12] : memref<16x128xf32, #tpu.memory_space<vmem>>, vector<16x128xf32>
    tpu.vector_store %arg5[%c0_11, %c0_12], %12 {strides = array<i32>} : memref<16x128xf32, #tpu.memory_space<vmem>>, vector<16x128xf32>,
    return
  }
}

</mosaic_0001>

<bundles_post_ra>
// kernel: fwd.1
= control target key start
LH: loop header
LB: loop body
LE: loop exit
PB: predicated region body
PF: predicated region fallthrough
CT: control target
= control target key end

     0   :  { %10 = vsyncpa [#allocation3], 0  ;;  %s323_s0 = inlined_call_operand.hbm [shape: f32[16,64], index: 0, kind: input, shape index: {}]   ;;  %s324_s1 = inlined_call_operand.hbm [shape: f32[64,128], index: 1, kind: input, shape index: {}]   ;;  %s325_s2 = inlined_call_operand.vmem [shape: f32[1,128], index: 2, kind: input, shape index: {}]   ;;  %s326_s3 = inlined_call_operand.hbm [shape: f32[128,128], index: 3, kind: input, shape index: {}]   ;;  %s327_s4 = inlined_call_operand.vmem [shape: f32[1,128], index: 4, kind: input, shape index: {}]   ;;  %s328_s5 = inlined_call_operand.vmem [shape: f32[16,128], index: 5, kind: output, shape index: {}]  }
   0x1   :  { %11 = vsyncpa [#allocation5], 0  ;;  %s29_s20 = sshll.u32 %s324_s1, 4  ;;  %s265_s21 = smov [#allocation4]   ;;  %s30_s20 = int_to_ptr.hbm [resolvable:$true] %s29_s20 }
   0x2   :  { %s31_s22 = sshll.u32 %s265_s21, 4  ;;  %s16_s25 = sshll.u32 %s323_s0, 4  ;;  %s32_s22 = int_to_ptr.vmem [resolvable:$true] %s31_s22  ;;  %s17_s25 = int_to_ptr.hbm [resolvable:$true] %s16_s25 }
   0x3   :  { %s266_s26 = smov 128   ;;  %s267_s27 = smov 8  }
   0x4   :  { %37 = dma.hbm_to_vmem [thread:$0]  %s30_s20, 1024, %s32_s22, [#allocation5], %s266_s26, %s266_s26, %s267_s27  }
   0x5   :  { %s268_s28 = smov [#allocation2]   ;;  %s44_s7 = sshll.u32 %s326_s3, 4  ;;  %s45_s7 = int_to_ptr.hbm [resolvable:$true] %s44_s7 }
   0x6   :  { %s18_s29 = sshll.u32 %s268_s28, 4  ;;  %s269_s1 = smov [#allocation6]   ;;  %s19_s29 = int_to_ptr.vmem [resolvable:$true] %s18_s29 }
   0x7   :  { %24 = dma.hbm_to_vmem [thread:$0]  %s17_s25, 256, %s19_s29, [#allocation3], %s266_s26, %s266_s26, %s267_s27  }
   0x8   :  { %s46_s8 = sshll.u32 %s269_s1, 4  ;;  %s47_s8 = int_to_ptr.vmem [resolvable:$true] %s46_s8 }
   0x9   :  { %52 = dma.hbm_to_vmem [thread:$0]  %s45_s7, 2048, %s47_s8, [#allocation5], %s266_s26, %s266_s26, %s267_s27  }
   0xa   :  { %261 = dma.done.wait [#allocation3], 256  }
   0xb   :  { %262 = vsyncadd [#allocation3], 4294967040 }
   0xc   :  { %263 = dma.done.wait [#allocation5], 3072  }
   0xd   :  { %264 = vsyncadd [#allocation5], 4294964224  ;;  %v76_v0 = vld [vmem:[#allocation4 + $0x38] sm:$0xff]  ;;  %v75_v1 = vld [vmem:[#allocation4 + $0x30] sm:$0xff]  ;;  %vm81_vm0 = vcmask 523264  }
   0xe   :  { %96 = vmatpush.msra.mxu0 %v76_v0  ;;  %v74_v2 = vld [vmem:[#allocation4 + $0x28] sm:$0xff]  ;;  %v128_v3 = vld [vmem:[#allocation6 + $0x78] sm:$0xff]  ;;  %v127_v4 = vld [vmem:[#allocation6 + $0x70] sm:$0xff] }
   0xf   :  { %v73_v5 = vld [vmem:[#allocation4 + $0x20] sm:$0xff]  ;;  %133 = vmatpush.msra.mxu1 %v128_v3  ;;  %166 = vmatpush.msra.mxu2 %v128_v3  ;;  %v126_v6 = vld [vmem:[#allocation6 + $0x68] sm:$0xff]  ;;  %v72_v7 = vld [vmem:[#allocation4 + $0x18] sm:$0xff] }
  0x10   :  { %97 = vmatpush.msra.mxu0 %v75_v1  ;;  %v125_v8 = vld [vmem:[#allocation6 + $0x60] sm:$0xff]  ;;  %v71_v9 = vld [vmem:[#allocation4 + $0x10] sm:$0xff]  ;;  %v124_v10 = vld [vmem:[#allocation6 + $0x58] sm:$0xff] }
  0x11   :  { %134 = vmatpush.msra.mxu1 %v127_v4  ;;  %167 = vmatpush.msra.mxu2 %v127_v4  ;;  %v70_v11 = vld [vmem:[#allocation4 + $0x8] sm:$0xff]  ;;  %v123_v12 = vld [vmem:[#allocation6 + $0x50] sm:$0xff]  ;;  %v69_v13 = vld [vmem:[#allocation4] sm:$0xff] }
  0x12   :  { %98 = vmatpush.msra.mxu0 %v74_v2  ;;  %v67_v14 = vld [vmem:[#allocation2] sm:$0xff]  ;;  %v122_v15 = vld [vmem:[#allocation6 + $0x48] sm:$0xff]  ;;  %v121_v16 = vld [vmem:[#allocation6 + $0x40] sm:$0xff] }
  0x13   :  { %135 = vmatpush.msra.mxu1 %v126_v6  ;;  %168 = vmatpush.msra.mxu2 %v126_v6  ;;  %v120_v17 = vld [vmem:[#allocation6 + $0x38] sm:$0xff]  ;;  %v119_v18 = vld [vmem:[#allocation6 + $0x30] sm:$0xff]  ;;  %v118_v20 = vld [vmem:[#allocation6 + $0x28] sm:$0xff] }
  0x14   :  { %99 = vmatpush.msra.mxu0 %v73_v5  ;;  %v68_v19 = vld [vmem:[#allocation2 + $0x8] sm:$0xff]  ;;  %v117_v21 = vld [vmem:[#allocation6 + $0x20] sm:$0xff]  ;;  %v115_v23 = vld [vmem:[#allocation6 + $0x10] sm:$0xff] }
  0x15   :  { %136 = vmatpush.msra.mxu1 %v125_v8  ;;  %169 = vmatpush.msra.mxu2 %v125_v8  ;;  %v116_v22 = vld [vmem:[#allocation6 + $0x18] sm:$0xff]  ;;  %v114_v24 = vld [vmem:[#allocation6 + $0x8] sm:$0xff]  ;;  %v113_v25 = vld [vmem:[#allocation6] sm:$0xff] }
  0x16   :  { %100 = vmatpush.msra.mxu0 %v72_v7  ;;  %v187_v26 = vld [vmem:[%s325_s2] ss:$0 sm:$0xff] }
  0x17   :  { %137 = vmatpush.msra.mxu1 %v124_v10  ;;  %170 = vmatpush.msra.mxu2 %v124_v10  ;;  %v188_v33 = vld [vmem:[%s327_s4] ss:$0 sm:$0xff] }
  0x18   :  { %101 = vmatpush.msra.mxu0 %v71_v9 }
  0x19   :  { %138 = vmatpush.msra.mxu1 %v123_v12  ;;  %171 = vmatpush.msra.mxu2 %v123_v12 }
  0x1a   :  { %102 = vmatpush.msra.mxu0 %v70_v11 }
  0x1b   :  { %139 = vmatpush.msra.mxu1 %v122_v15  ;;  %172 = vmatpush.msra.mxu2 %v122_v15 }
  0x1c   :  { %103 = vmatpush.msra.mxu0 %v69_v13 }
  0x1d   :  { %164 = vmatmul.msk.f32.vlgmr.msra.gmra.mxu0 %vm81_vm0, %v67_v14  ;;  %140 = vmatpush.msra.mxu1 %v121_v16 }
  0x1e   :  { %173 = vmatpush.msra.mxu2 %v121_v16 }
  0x1f   :  { %141 = vmatpush.msra.mxu1 %v120_v17 }
  0x20   :  { %174 = vmatpush.msra.mxu2 %v120_v17 }
  0x21   :  { %142 = vmatpush.msra.mxu1 %v119_v18 }
  0x22   :  { %175 = vmatpush.msra.mxu2 %v119_v18 }
  0x23   :  { %143 = vmatpush.msra.mxu1 %v118_v20 }
  0x24   :  { %176 = vmatpush.msra.mxu2 %v118_v20 }
  0x25   :  { %165 = vmatmul.msk.f32.gmra.mxu0 %vm81_vm0, %v68_v19  ;;  %144 = vmatpush.msra.mxu1 %v117_v21 }
  0x26   :  { %177 = vmatpush.msra.mxu2 %v117_v21 }
  0x27   :  { %145 = vmatpush.msra.mxu1 %v116_v22 }
  0x28   :  { %178 = vmatpush.msra.mxu2 %v116_v22 }
  0x29   :  { %146 = vmatpush.msra.mxu1 %v115_v23 }
  0x2a   :  { %179 = vmatpush.msra.mxu2 %v115_v23 }
  0x2b   :  { %147 = vmatpush.msra.mxu1 %v114_v24 }
  0x2c   :  { %180 = vmatpush.msra.mxu2 %v114_v24 }
  0x2d   :  { %148 = vmatpush.msra.mxu1 %v113_v25 }
  0x2e   :  { %181 = vmatpush.msra.mxu2 %v113_v25 }
  0x9a   :  { %v105_v27 = vpop.f32.mrf.mxu0 }
  0x9b   :  { %v106_v28 = vadd.f32 %v187_v26, %v105_v27 }
  0x9d   :  { %v111_v29 = vmax.f32 %v106_v28, 0.0 }
  0x9f   :  { %149 = vmatmul.f32.vlgmr.msra.gmra.mxu1 %v111_v29 }
  0xa2   :  { %v108_v30 = vpop.f32.mrf.mxu0 }
  0xa3   :  { %v109_v31 = vadd.f32 %v187_v26, %v108_v30 }
  0xa5   :  { %v112_v32 = vmax.f32 %v109_v31, 0.0 }
  0xa7   :  { %152 = vmatmul.f32.vlgmr.msra.gmra.mxu2 %v112_v32 }
 0x11c   :  { %v150_v34 = vpop.f32.mrf.mxu1 }
 0x11d   :  { %v151_v35 = vadd.f32 %v188_v33, %v150_v34 }
 0x11f   :  { %156 = vst [vmem:[%s328_s5] sm:$0xff] %v151_v35 }
 0x12a   :  { %v153_v36 = vpop.f32.mrf.mxu2 }
 0x12b   :  { %v154_v37 = vadd.f32 %v188_v33, %v153_v36 }
 0x12d   :  { %157 = vst [vmem:[%s328_s5 + $0x8] sm:$0xff] %v154_v37 }
 0x12e   :  { %162 = vsyncpa [#allocation3], 1 }
 0x12f   :  { %163 = vsyncpa [#allocation5], 1 }

</bundles_post_ra>
